<compile_context>
chip_gen: v5e
topology: v5e:2x2
jax: 0.10.0
libtpu: 0.0.40
codegen_flags: <defaults>
</compile_context>

<pallas_src>
import math

import jax
import jax.numpy as jnp
from jax.experimental import pallas as pl
from jax.experimental.pallas import tpu as pltpu

# ----------------------------------------------------------------------------
# Problem sizes (small synthetic shapes consistent with the module).
# ----------------------------------------------------------------------------
N_BATCH = 2
C_IN = 4
H = 16
W = 16
C_MID = 16
C_OUT = 1
HW = H * W
K3 = 3          # 3x3 convs
K1 = K3 * K3 * C_IN      # 36   layer-1 contraction
K2 = K3 * K3 * C_MID     # 144  layer-2 contraction
NB = 2 * C_MID + C_OUT   # 33   packed bias rows


# ----------------------------------------------------------------------------
# Fused Pallas kernel: conv3x3+ReLU -> conv3x3+ReLU -> conv1x1+Sigmoid.
# One batch element per grid step, everything stays in VMEM / vregs.
# ----------------------------------------------------------------------------
def fused_net_kernel(x1_ref, w1t_ref, w2t_ref, w3t_ref, b_ref, o_ref):
    """
    x1_ref : (1, K1, HW)     bf16  layer-1 im2col patches, channel-major rows
    w1t_ref: (C_MID, K1)     bf16  conv #1 weights, transposed
    w2t_ref: (C_MID, K2)     bf16  conv #2 weights, transposed
    w3t_ref: (C_OUT, C_MID)  bf16  1x1 conv #3 weights, transposed
    b_ref  : (NB, 1)         f32   packed bias columns [b1 | b2 | b3]
    o_ref  : (1, C_OUT, HW)  f32   sigmoid mask, lane-dense (HW on lanes)
    """
    f32 = jnp.float32
    bf16 = jnp.bfloat16

    b = b_ref[...]                                  # (33, 1) f32
    b1 = b[0:C_MID]                                 # (16, 1)
    b2 = b[C_MID:2 * C_MID]                         # (16, 1)
    b3 = b[2 * C_MID:NB]                            # (1, 1)

    # ----- layer 1: 3x3 "same" conv (C_IN -> C_MID) + ReLU -------------------
    # Single MXU pass: (16, 36) @ (36, 256), f32 accumulation, bias folded in.
    x1 = x1_ref[0]                                  # (36, 256) bf16
    h1 = jnp.maximum(
        jnp.dot(w1t_ref[...], x1, preferred_element_type=f32) + b1, 0.0)
    h1b = h1.astype(bf16)                           # (16, 256) cast once

    # ----- layer-2 im2col in registers ---------------------------------------
    # Zero-extend the flattened HW axis by (W+1) on both sides: vertical "same"
    # padding (shifts of +-W) then falls into the zero halo automatically.
    # The 9 taps are static lane-shifted slices; only the horizontal halo
    # (shift +-1 crossing a row boundary) needs an explicit iota mask.
    zpad = jnp.zeros((C_MID, W + 1), bf16)
    h1ext = jnp.concatenate([zpad, h1b, zpad], axis=1)      # (16, 290)

    col = jax.lax.broadcasted_iota(jnp.int32, (1, HW), 1)
    wcoord = col % W
    not_left = wcoord > 0            # valid positions for a dw = -1 tap
    not_right = wcoord < (W - 1)     # valid positions for a dw = +1 tap

    taps = []
    for kh in range(K3):
        for kw in range(K3):
            d = (kh - 1) * W + (kw - 1)
            start = d + (W + 1)                               # in [0, 34]
            t = h1ext[:, start:start + HW]                    # (16, 256)
            if kw == 0:
                t = jnp.where(not_left, t, jnp.zeros_like(t))
            elif kw == 2:
                t = jnp.where(not_right, t, jnp.zeros_like(t))
            taps.append(t)
    taps_all = jnp.concatenate(taps, axis=0)                  # (144, 256) bf16

    # ----- layer 2: 3x3 "same" conv (C_MID -> C_MID) + ReLU ------------------
    # Single MXU pass: (16, 144) @ (144, 256).
    h2 = jnp.maximum(
        jnp.dot(w2t_ref[...], taps_all, preferred_element_type=f32) + b2, 0.0)

    # ----- layer 3: 1x1 conv (C_MID -> C_OUT) + sigmoid ----------------------
    # (1, 16) @ (16, 256): the HBM store is a clean lane-dense (1, 256) row.
    logits = jnp.dot(w3t_ref[...], h2.astype(bf16),
                     preferred_element_type=f32) + b3
    o_ref[0] = jax.nn.sigmoid(logits).astype(o_ref.dtype)


# ----------------------------------------------------------------------------
# Wrapper: layout plumbing only (wrapper-side layer-1 im2col, weight flatten).
# ----------------------------------------------------------------------------
def net_forward(img_nchw, params):
    (w1, b1), (w2, b2), (w3, b3) = params
    n, c_in, h, w = img_nchw.shape
    assert (c_in, h, w) == (C_IN, H, W)

    # Layer-1 im2col in the wrapper, transposed/channel-major: (n, 36, HW).
    # Row order: tap (kh, kw) major, input channel minor -> matches the
    # (3,3,Cin,Cmid) weight reshape below.
    x = img_nchw.astype(jnp.float32)
    xpad = jnp.pad(x, ((0, 0), (0, 0), (1, 1), (1, 1)))      # (n, Cin, H+2, W+2)
    patch_list = [
        xpad[:, :, kh:kh + H, kw:kw + W].reshape(n, C_IN, HW)
        for kh in range(K3) for kw in range(K3)
    ]
    x_patches = jnp.concatenate(patch_list, axis=1).astype(jnp.bfloat16)  # (n,36,256)

    w1t = jnp.transpose(w1.reshape(K1, C_MID)).astype(jnp.bfloat16)       # (16, 36)
    w2t = jnp.transpose(w2.reshape(K2, C_MID)).astype(jnp.bfloat16)       # (16, 144)
    w3t = jnp.transpose(w3.reshape(C_MID, C_OUT)).astype(jnp.bfloat16)    # (1, 16)
    b_all = jnp.concatenate(
        [b1.reshape(C_MID, 1), b2.reshape(C_MID, 1), b3.reshape(C_OUT, 1)],
        axis=0).astype(jnp.float32)                                       # (33, 1)

    out = pl.pallas_call(
        fused_net_kernel,
        out_shape=jax.ShapeDtypeStruct((n, C_OUT, HW), jnp.float32),
        grid_spec=pltpu.PrefetchScalarGridSpec(
            num_scalar_prefetch=0,
            grid=(n,),   # one image per step; 2 parallel steps for v7x's 2 TCs
            in_specs=[
                pl.BlockSpec((1, K1, HW), lambda i: (i, 0, 0)),
                pl.BlockSpec((C_MID, K1), lambda i: (0, 0)),
                pl.BlockSpec((C_MID, K2), lambda i: (0, 0)),
                pl.BlockSpec((C_OUT, C_MID), lambda i: (0, 0)),
                pl.BlockSpec((NB, 1), lambda i: (0, 0)),
            ],
            out_specs=pl.BlockSpec((1, C_OUT, HW), lambda i: (i, 0, 0)),
        ),
        compiler_params=pltpu.CompilerParams(
            dimension_semantics=("parallel",)),
    )(x_patches, w1t, w2t, w3t, b_all)

    return out.reshape(n, C_OUT, H, W)               # NCHW (n, 1, H, W)


# ----------------------------------------------------------------------------
# Plain-JAX reference (same math, f32) for a correctness check.
# ----------------------------------------------------------------------------
def reference_forward(img_nchw, params):
    (w1, b1), (w2, b2), (w3, b3) = params
    x = jnp.transpose(img_nchw, (0, 2, 3, 1)).astype(jnp.float32)

    def conv(z, w, b):
        y = jax.lax.conv_general_dilated(
            z, w, window_strides=(1, 1), padding="SAME",
            dimension_numbers=("NHWC", "HWIO", "NHWC"))
        return y + b.reshape(1, 1, 1, -1)

    y = jax.nn.relu(conv(x, w1, b1))
    y = jax.nn.relu(conv(y, w2, b2))
    y = jax.nn.sigmoid(conv(y, w3, b3))
    return jnp.transpose(y, (0, 3, 1, 2))


# ----------------------------------------------------------------------------
# Deterministic parameter init (PyTorch Conv2d-style uniform).
# ----------------------------------------------------------------------------
def init_params(key):
    def conv_init(k_w, k_b, ksz, cin, cout):
        bound = 1.0 / math.sqrt(cin * ksz * ksz)
        w = jax.random.uniform(k_w, (ksz, ksz, cin, cout), jnp.float32,
                               -bound, bound)
        b = jax.random.uniform(k_b, (1, cout), jnp.float32, -bound, bound)
        return w, b

    ks = jax.random.split(key, 6)
    p1 = conv_init(ks[0], ks[1], 3, C_IN, C_MID)
    p2 = conv_init(ks[2], ks[3], 3, C_MID, C_MID)
    p3 = conv_init(ks[4], ks[5], 1, C_MID, C_OUT)
    return (p1, p2, p3)


# ----------------------------------------------------------------------------
if __name__ == "__main__":
    key = jax.random.PRNGKey(0)
    k_img, k_par = jax.random.split(key)

    img = jax.random.normal(k_img, (N_BATCH, C_IN, H, W), jnp.float32)  # NCHW
    params = init_params(k_par)

    fwd = jax.jit(net_forward)
    out = jax.block_until_ready(fwd(img, params))

    assert out.shape == (N_BATCH, C_OUT, H, W), out.shape
    assert bool(jnp.all(jnp.isfinite(out)))
    assert bool(jnp.all((out >= 0.0) & (out <= 1.0)))  # sigmoid mask range

    # Numerical check vs. plain-JAX f32 reference (bf16 MXU inputs -> loose tol).
    ref = jax.block_until_ready(reference_forward(img, params))
    max_err = float(jnp.max(jnp.abs(out - ref)))
    assert max_err < 5e-2, max_err

    print("KERNEL_OK")
</pallas_src>

<mosaic_0001>
module attributes {stable_mosaic.version = 11 : i64} {
  func.func @fused_net_kernel(%arg0: i32, %arg1: memref<1x36x256xbf16, #tpu.memory_space<vmem>>, %arg2: memref<16x36xbf16, #tpu.memory_space<vmem>>, %arg3: memref<16x144xbf16, #tpu.memory_space<vmem>>, %arg4: memref<1x16xbf16, #tpu.memory_space<vmem>>, %arg5: memref<33x1xf32, #tpu.memory_space<vmem>>, %arg6: memref<1x1x256xf32, #tpu.memory_space<vmem>>) attributes {dimension_semantics = [#tpu.dimension_semantics<parallel>], iteration_bounds = array<i64: 2>, scalar_prefetch = 0 : i64, scratch_operands = 0 : i64, tpu.core_type = #tpu.core_type<tc>, window_params = [{transform_indices = @transform_0, window_bounds = array<i64: 1, 36, 256>}, {pipeline_mode = #tpu.pipeline_mode<synchronous>, transform_indices = @transform_1, window_bounds = array<i64: 16, 36>}, {pipeline_mode = #tpu.pipeline_mode<synchronous>, transform_indices = @transform_2, window_bounds = array<i64: 16, 144>}, {pipeline_mode = #tpu.pipeline_mode<synchronous>, transform_indices = @transform_3, window_bounds = array<i64: 1, 16>}, {pipeline_mode = #tpu.pipeline_mode<synchronous>, transform_indices = @transform_4, window_bounds = array<i64: 33, 1>}, {transform_indices = @transform_5, window_bounds = array<i64: 1, 1, 256>}]} {
    %c0 = arith.constant 0 : index
    %c0_0 = arith.constant 0 : index
    %0 = vector.load %arg5[%c0, %c0_0] : memref<33x1xf32, #tpu.memory_space<vmem>>, vector<33x1xf32>
    %1 = vector.extract_strided_slice %0 {offsets = [0, 0], sizes = [16, 1], strides = [1, 1]} : vector<33x1xf32> to vector<16x1xf32>
    %2 = vector.extract_strided_slice %0 {offsets = [16, 0], sizes = [16, 1], strides = [1, 1]} : vector<33x1xf32> to vector<16x1xf32>
    %3 = vector.extract_strided_slice %0 {offsets = [32, 0], sizes = [1, 1], strides = [1, 1]} : vector<33x1xf32> to vector<1x1xf32>
    %c0_1 = arith.constant 0 : index
    %c0_2 = arith.constant 0 : index
    %c0_3 = arith.constant 0 : index
    %4 = vector.load %arg1[%c0_1, %c0_2, %c0_3] : memref<1x36x256xbf16, #tpu.memory_space<vmem>>, vector<1x36x256xbf16>
    %5 = vector.shape_cast %4 : vector<1x36x256xbf16> to vector<36x256xbf16>
    %c0_4 = arith.constant 0 : index
    %c0_5 = arith.constant 0 : index
    %6 = vector.load %arg2[%c0_4, %c0_5] : memref<16x36xbf16, #tpu.memory_space<vmem>>, vector<16x36xbf16>
    %cst = arith.constant dense<0.000000e+00> : vector<16x256xf32>
    %7 = tpu.matmul %6, %5, %cst {dimension_numbers = #tpu.dot_dimension_numbers<[1], [0], [0], [1], [0, 0, 1, 1], [], []>} : vector<16x36xbf16>, vector<36x256xbf16>, vector<16x256xf32> -> vector<16x256xf32>
    %8 = vector.broadcast %1 : vector<16x1xf32> to vector<16x256xf32>
    %9 = arith.addf %7, %8 : vector<16x256xf32>
    %cst_6 = arith.constant 0.000000e+00 : f32
    %10 = vector.broadcast %cst_6 : f32 to vector<16x256xf32>
    %11 = arith.maximumf %9, %10 : vector<16x256xf32>
    %12 = arith.truncf %11 : vector<16x256xf32> to vector<16x256xbf16>
    %cst_7 = arith.constant 0.000000e+00 : bf16
    %13 = vector.broadcast %cst_7 : bf16 to vector<16x17xbf16>
    %14 = tpu.concatenate %13, %12, %13 in 1 : vector<16x17xbf16>, vector<16x256xbf16>, vector<16x17xbf16> -> vector<16x290xbf16>
    %15 = tpu.iota {dimensions = array<i32: 1>} : vector<1x256xi32>
    %c16_i32 = arith.constant 16 : i32
    %c0_i32 = arith.constant 0 : i32
    %16 = arith.cmpi eq, %c16_i32, %c0_i32 : i32
    %c1_i32 = arith.constant 1 : i32
    %17 = arith.select %16, %c1_i32, %c16_i32 : i32
    %18 = vector.broadcast %17 : i32 to vector<1x256xi32>
    %19 = arith.remsi %15, %18 : vector<1x256xi32>
    %c0_i32_8 = arith.constant 0 : i32
    %20 = vector.broadcast %c0_i32_8 : i32 to vector<1x256xi32>
    %21 = arith.cmpi ne, %19, %20 : vector<1x256xi32>
    %c0_i32_9 = arith.constant 0 : i32
    %22 = vector.broadcast %c0_i32_9 : i32 to vector<1x256xi32>
    %23 = arith.cmpi slt, %19, %22 : vector<1x256xi32>
    %c0_i32_10 = arith.constant 0 : i32
    %24 = arith.cmpi slt, %17, %c0_i32_10 : i32
    %25 = vector.broadcast %24 : i1 to vector<1x256xi1>
    %26 = vector.broadcast %25 : vector<1x256xi1> to vector<1x256xi1>
    %27 = arith.xori %23, %26 : vector<1x256xi1>
    %28 = arith.andi %27, %21 : vector<1x256xi1>
    %29 = vector.broadcast %17 : i32 to vector<1x256xi32>
    %30 = arith.addi %19, %29 : vector<1x256xi32>
    %31 = arith.select %28, %30, %19 : vector<1x256xi1>, vector<1x256xi32>
    %c0_i32_11 = arith.constant 0 : i32
    %32 = vector.broadcast %c0_i32_11 : i32 to vector<1x256xi32>
    %33 = arith.cmpi sgt, %31, %32 : vector<1x256xi32>
    %c15_i32 = arith.constant 15 : i32
    %34 = vector.broadcast %c15_i32 : i32 to vector<1x256xi32>
    %35 = arith.cmpi slt, %31, %34 : vector<1x256xi32>
    %36 = vector.extract_strided_slice %14 {offsets = [0, 0], sizes = [16, 256], strides = [1, 1]} : vector<16x290xbf16> to vector<16x256xbf16>
    %cst_12 = arith.constant 0.000000e+00 : bf16
    %37 = vector.broadcast %cst_12 : bf16 to vector<16x256xbf16>
    %38 = vector.shape_cast %33 : vector<1x256xi1> to vector<1x256xi1>
    %39 = vector.broadcast %38 : vector<1x256xi1> to vector<16x256xi1>
    %40 = arith.select %39, %36, %37 : vector<16x256xi1>, vector<16x256xbf16>
    %41 = vector.extract_strided_slice %14 {offsets = [0, 1], sizes = [16, 256], strides = [1, 1]} : vector<16x290xbf16> to vector<16x256xbf16>
    %42 = vector.extract_strided_slice %14 {offsets = [0, 2], sizes = [16, 256], strides = [1, 1]} : vector<16x290xbf16> to vector<16x256xbf16>
    %cst_13 = arith.constant 0.000000e+00 : bf16
    %43 = vector.broadcast %cst_13 : bf16 to vector<16x256xbf16>
    %44 = vector.shape_cast %35 : vector<1x256xi1> to vector<1x256xi1>
    %45 = vector.broadcast %44 : vector<1x256xi1> to vector<16x256xi1>
    %46 = arith.select %45, %42, %43 : vector<16x256xi1>, vector<16x256xbf16>
    %47 = vector.extract_strided_slice %14 {offsets = [0, 16], sizes = [16, 256], strides = [1, 1]} : vector<16x290xbf16> to vector<16x256xbf16>
    %cst_14 = arith.constant 0.000000e+00 : bf16
    %48 = vector.broadcast %cst_14 : bf16 to vector<16x256xbf16>
    %49 = vector.shape_cast %33 : vector<1x256xi1> to vector<1x256xi1>
    %50 = vector.broadcast %49 : vector<1x256xi1> to vector<16x256xi1>
    %51 = arith.select %50, %47, %48 : vector<16x256xi1>, vector<16x256xbf16>
    %52 = vector.extract_strided_slice %14 {offsets = [0, 17], sizes = [16, 256], strides = [1, 1]} : vector<16x290xbf16> to vector<16x256xbf16>
    %53 = vector.extract_strided_slice %14 {offsets = [0, 18], sizes = [16, 256], strides = [1, 1]} : vector<16x290xbf16> to vector<16x256xbf16>
    %cst_15 = arith.constant 0.000000e+00 : bf16
    %54 = vector.broadcast %cst_15 : bf16 to vector<16x256xbf16>
    %55 = vector.shape_cast %35 : vector<1x256xi1> to vector<1x256xi1>
    %56 = vector.broadcast %55 : vector<1x256xi1> to vector<16x256xi1>
    %57 = arith.select %56, %53, %54 : vector<16x256xi1>, vector<16x256xbf16>
    %58 = vector.extract_strided_slice %14 {offsets = [0, 32], sizes = [16, 256], strides = [1, 1]} : vector<16x290xbf16> to vector<16x256xbf16>
    %cst_16 = arith.constant 0.000000e+00 : bf16
    %59 = vector.broadcast %cst_16 : bf16 to vector<16x256xbf16>
    %60 = vector.shape_cast %33 : vector<1x256xi1> to vector<1x256xi1>
    %61 = vector.broadcast %60 : vector<1x256xi1> to vector<16x256xi1>
    %62 = arith.select %61, %58, %59 : vector<16x256xi1>, vector<16x256xbf16>
    %63 = vector.extract_strided_slice %14 {offsets = [0, 33], sizes = [16, 256], strides = [1, 1]} : vector<16x290xbf16> to vector<16x256xbf16>
    %64 = vector.extract_strided_slice %14 {offsets = [0, 34], sizes = [16, 256], strides = [1, 1]} : vector<16x290xbf16> to vector<16x256xbf16>
    %cst_17 = arith.constant 0.000000e+00 : bf16
    %65 = vector.broadcast %cst_17 : bf16 to vector<16x256xbf16>
    %66 = vector.shape_cast %35 : vector<1x256xi1> to vector<1x256xi1>
    %67 = vector.broadcast %66 : vector<1x256xi1> to vector<16x256xi1>
    %68 = arith.select %67, %64, %65 : vector<16x256xi1>, vector<16x256xbf16>
    %69 = tpu.concatenate %40, %41, %46, %51, %52, %57, %62, %63, %68 in 0 : vector<16x256xbf16>, vector<16x256xbf16>, vector<16x256xbf16>, vector<16x256xbf16>, vector<16x256xbf16>, vector<16x256xbf16>, vector<16x256xbf16>, vector<16x256xbf16>, vector<16x256xbf16> -> vector<144x256xbf16>
    %c0_18 = arith.constant 0 : index
    %c0_19 = arith.constant 0 : index
    %70 = vector.load %arg3[%c0_18, %c0_19] : memref<16x144xbf16, #tpu.memory_space<vmem>>, vector<16x144xbf16>
    %cst_20 = arith.constant dense<0.000000e+00> : vector<16x256xf32>
    %71 = tpu.matmul %70, %69, %cst_20 {dimension_numbers = #tpu.dot_dimension_numbers<[1], [0], [0], [1], [0, 0, 1, 1], [], []>} : vector<16x144xbf16>, vector<144x256xbf16>, vector<16x256xf32> -> vector<16x256xf32>
    %72 = vector.broadcast %2 : vector<16x1xf32> to vector<16x256xf32>
    %73 = arith.addf %71, %72 : vector<16x256xf32>
    %cst_21 = arith.constant 0.000000e+00 : f32
    %74 = vector.broadcast %cst_21 : f32 to vector<16x256xf32>
    %75 = arith.maximumf %73, %74 : vector<16x256xf32>
    %c0_22 = arith.constant 0 : index
    %c0_23 = arith.constant 0 : index
    %76 = vector.load %arg4[%c0_22, %c0_23] : memref<1x16xbf16, #tpu.memory_space<vmem>>, vector<1x16xbf16>
    %77 = arith.truncf %75 : vector<16x256xf32> to vector<16x256xbf16>
    %cst_24 = arith.constant dense<0.000000e+00> : vector<1x256xf32>
    %78 = tpu.matmul %76, %77, %cst_24 {dimension_numbers = #tpu.dot_dimension_numbers<[1], [0], [0], [1], [0, 0, 1, 1], [], []>} : vector<1x16xbf16>, vector<16x256xbf16>, vector<1x256xf32> -> vector<1x256xf32>
    %79 = vector.broadcast %3 : vector<1x1xf32> to vector<1x256xf32>
    %80 = arith.addf %78, %79 : vector<1x256xf32>
    %81 = arith.negf %80 : vector<1x256xf32>
    %82 = math.exp %81 : vector<1x256xf32>
    %cst_25 = arith.constant 1.000000e+00 : f32
    %83 = vector.broadcast %cst_25 : f32 to vector<1x256xf32>
    %84 = arith.addf %83, %82 : vector<1x256xf32>
    %85 = arith.divf %83, %84 : vector<1x256xf32>
    %c0_26 = arith.constant 0 : index
    %c0_27 = arith.constant 0 : index
    %c0_28 = arith.constant 0 : index
    %86 = vector.load %arg6[%c0_26, %c0_27, %c0_28] : memref<1x1x256xf32, #tpu.memory_space<vmem>>, vector<1x1x256xf32>
    %87 = vector.shape_cast %86 : vector<1x1x256xf32> to vector<1x256xf32>
    %88 = vector.shape_cast %85 : vector<1x256xf32> to vector<1x1x256xf32>
    tpu.vector_store %arg6[%c0_26, %c0_27, %c0_28], %88 {strides = array<i32>} : memref<1x1x256xf32, #tpu.memory_space<vmem>>, vector<1x1x256xf32>,
    return
  }
  func.func @transform_0(%arg0: i32) -> (i32, i32, i32) {
    %c0_i32 = arith.constant 0 : i32
    %c0_i32_0 = arith.constant 0 : i32
    %c0_i32_1 = arith.constant 0 : i32
    return %arg0, %c0_i32, %c0_i32_0 : i32, i32, i32
  }
  func.func @transform_1(%arg0: i32) -> (i32, i32) {
    %c0_i32 = arith.constant 0 : i32
    %c0_i32_0 = arith.constant 0 : i32
    %c0_i32_1 = arith.constant 0 : i32
    return %c0_i32, %c0_i32_0 : i32, i32
  }
  func.func @transform_2(%arg0: i32) -> (i32, i32) {
    %c0_i32 = arith.constant 0 : i32
    %c0_i32_0 = arith.constant 0 : i32
    %c0_i32_1 = arith.constant 0 : i32
    return %c0_i32, %c0_i32_0 : i32, i32
  }
  func.func @transform_3(%arg0: i32) -> (i32, i32) {
    %c0_i32 = arith.constant 0 : i32
    %c0_i32_0 = arith.constant 0 : i32
    %c0_i32_1 = arith.constant 0 : i32
    return %c0_i32, %c0_i32_0 : i32, i32
  }
  func.func @transform_4(%arg0: i32) -> (i32, i32) {
    %c0_i32 = arith.constant 0 : i32
    %c0_i32_0 = arith.constant 0 : i32
    %c0_i32_1 = arith.constant 0 : i32
    return %c0_i32, %c0_i32_0 : i32, i32
  }
  func.func @transform_5(%arg0: i32) -> (i32, i32, i32) {
    %c0_i32 = arith.constant 0 : i32
    %c0_i32_0 = arith.constant 0 : i32
    %c0_i32_1 = arith.constant 0 : i32
    return %arg0, %c0_i32, %c0_i32_0 : i32, i32, i32
  }
}

</mosaic_0001>

<bundles_post_ra>
// kernel: net_forward.1
= control target key start
LH: loop header
LB: loop body
LE: loop exit
PB: predicated region body
PF: predicated region fallthrough
CT: control target
= control target key end

     0   :  { %s1028_s18 = smov 0   ;;  %s1330_s0 = inlined_call_operand.vmem [shape: bf16[2,36,256], index: 0, kind: input, shape index: {}]   ;;  %s1331_s1 = inlined_call_operand.vmem [shape: bf16[16,36], index: 1, kind: input, shape index: {}]   ;;  %s1332_s2 = inlined_call_operand.vmem [shape: bf16[16,144], index: 2, kind: input, shape index: {}]   ;;  %s1333_s3 = inlined_call_operand.vmem [shape: bf16[1,16], index: 3, kind: input, shape index: {}]   ;;  %s1334_s4 = inlined_call_operand.vmem [shape: f32[33,1], index: 4, kind: input, shape index: {}]   ;;  %s1335_s5 = inlined_call_operand.vmem [shape: f32[2,1,256], index: 5, kind: output, shape index: {}]  }
   0x1 LB: > { %s888_s19 = sadd.s32 4294967295, %s981_s18   ;;  %p892_p0 = scmp.ge.s32.totalorder %s981_s18, 1  ;;  %s981_s18 = sphi %s1028_s18, %s15_s18  }
   0x2   : > { %p187_p1 = scmp.lt.s32.totalorder %s981_s18, 3 }
   0x4   : > { %p188_p2 = pnand %p892_p0, %p187_p1 }
   0x5   : > { %p214_p3 = scmp.lt.s32.totalorder (!%p188_p2), %s888_s19, 1  ;;  %s984_s28 = smov (!%p188_p2), 32  }
   0x6   : > { %191 = sbr.rel (%p188_p2) target bundleno = 765 (0x2fd), region = 40  ;;  %s985_s29 = smov (!%p188_p2), 18  }
   0x7   : > { %s986_s30 = smov (!%p188_p2), 34   ;;  %s987_s8 = smov (!%p188_p2), 16  }
   0x8   : > { %s988_s9 = smov (!%p188_p2), 2   ;;  %s989_s10 = smov (!%p188_p2), 17  }
   0x9   : > { %s990_s11 = smov (!%p188_p2), 95   ;;  %s991_s12 = smov (!%p188_p2), 96  }
   0xa   : > { %s992_s13 = smov (!%p188_p2), 110   ;;  %s993_s14 = smov (!%p188_p2), 111  }
   0xb   : > { %v226_v0 = vld [vmem:[%s1334_s4] sm:$0xff]  ;;  %v346_v1 = vlaneseq  ;;  %v983_v2 = vmov 0   ;;  %s1363_s19 = smov (!%p214_p3, %s888_s19), 1  ;;  %v227_v7 = vld [vmem:[%s1334_s4 + $0x8] sm:$0xff]  ;;  %vm282_vm0 = vcmask 1041408   ;;  %vm278_vm7 = vcmask 293888  }
   0xc   : > { %964 = vset.pattern.permute.xlu0 %v983_v2  ;;  %965 = vset.pattern.permute.xlu2 %v983_v2  ;;  %s940_s22 = smul.u32 40, %s1363_s19  ;;  %v937_v34 = vld [vmem:[%s1331_s1] sm:$0xff]  ;;  %v1076_v59 = vunpack.c.l.b16 %v983_v2  ;;  %v1079_v62 = vunpack.c.h.b16 %v983_v2  ;;  %vm335_vm14 = vcmask 138240   ;;  %s994_s15 = smov 94  }
   0xd   : > { %240 = vperm.xlu0 %964, %v226_v0   ;;  %v347_v3 = vand.u32 127, %v346_v1  ;;  %966 = vset.pattern.permute.xlu1 %v983_v2  ;;  %s995_s16 = smov 112   ;;  %s996_s17 = smov 126  }
   0xe   : > { %s218_s25 = scalar_lea.vmem %s1330_s0, %s940_s22  ;;  %s997_s20 = smov 127  }
   0xf   : > { %v348_v4 = vadd.s32 128, %v347_v3  ;;  %v353_v5 = vand.u32 15, %v347_v3  ;;  %v235_v6 = vld [vmem:[%s218_s25 + $0x20] sm:$0x33]  ;;  %v909_v11 = vld [vmem:[%s218_s25 + $0x10] sm:$0xf] }
  0x10   : > { %v266_v9 = vunpack.c.l.b16 %v235_v6  ;;  %v267_v10 = vunpack.c.h.b16 %v235_v6  ;;  %v936_v16 = vld [vmem:[%s218_s25 + $0x14] sm:$0xf0]  ;;  %v935_v17 = vld [vmem:[%s218_s25 + $0x14] sm:$0xf]  ;;  %v911_v18 = vld [vmem:[%s218_s25 + $0x18] sm:$0xf0] }
  0x11   : > { %v360_v8 = vand.u32 15, %v348_v4  ;;  %vm1052_vm1 = vcmp.gt.s32.totalorder %v353_v5, 0  ;;  %vm1056_vm2 = vcmp.lt.s32.totalorder %v353_v5, 15  ;;  %v910_v22 = vor.u32 %v936_v16, %v909_v11  ;;  %v901_v24 = vld [vmem:[%s218_s25] sm:$0xf] }
  0x12   : > { %v272_v14 = vpack.c.b16 %v266_v9, %v266_v9  ;;  %v273_v15 = vpack.c.b16 %v267_v10, %v267_v10  ;;  %v914_v23 = vor.u32 %v935_v17, %v911_v18  ;;  %v934_v25 = vld [vmem:[%s218_s25 + $0x4] sm:$0xf0]  ;;  %v933_v27 = vld [vmem:[%s218_s25 + $0x4] sm:$0xf]  ;;  %v903_v28 = vld [vmem:[%s218_s25 + $0x8] sm:$0xf0] }
  0x13   : > { %vm374_vm3 = vcmp.gt.s32.totalorder %v360_v8, 0  ;;  %vm1060_vm4 = vcmp.lt.s32.totalorder %v360_v8, 15  ;;  %v902_v32 = vor.u32 %v934_v25, %v901_v24  ;;  %v906_v33 = vor.u32 %v933_v27, %v903_v28 }
  0x14   : > { %v284_v20 = vsel %vm282_vm0, %v272_v14, 0  ;;  %v287_v21 = vsel %vm282_vm0, %v273_v15, 0  ;;  %vm381_vm5 = vmpackc.low %vm374_vm3, %vm1052_vm1 }
  0x15   : > { %245 = vperm.xlu0 %964, %v227_v7   ;;  %294 = vmatpush.bf16.msra.mxu0 %v284_v20  ;;  %v382_v26 = vsel %vm381_vm5, 65537, %v983_v2  ;;  %vm405_vm6 = vmpackc.low %vm1060_vm4, %vm1056_vm2  ;;  %vm503_vm2 = vcmask 261120  }
  0x16   : > { %308 = vmatpush.bf16.msra.mxu1 %v287_v21  ;;  %v383_v29 = vperm.slane %v382_v26, 0  ;;  %v406_v30 = vsel %vm405_vm6, 65537, %v983_v2  ;;  %v384_v35 = vperm.slane %v382_v26, 4  ;;  %vm473_vm6 = vcmask 146432  }
  0x17   : > { %v407_v31 = vperm.slane %v406_v30, 0  ;;  %v408_v36 = vperm.slane %v406_v30, 4 }
  0x18   : > { %499 = vrot.lane.b32.xlu1 %v383_v29, %s984_s28  ;;  %v385_v60 = vunpack.c.l.b16 %v383_v29  ;;  %v386_v61 = vunpack.c.h.b16 %v383_v29  ;;  %v392_v3 = vunpack.c.l.b16 %v384_v35  ;;  %v393_v4 = vunpack.c.h.b16 %v384_v35 }
  0x19   : > { %295 = vmatpush.bf16.msra.mxu0 %v910_v22  ;;  %529 = vrot.lane.b32.xlu2 %v407_v31, %s986_s30 }
  0x1a   : > { %309 = vmatpush.bf16.msra.mxu1 %v914_v23  ;;  %vm1082_vm8 = vcmp.ne.s32.totalorder %v385_v60, %v1076_v59  ;;  %vm1087_vm9 = vcmp.ne.s32.totalorder %v386_v61, %v1079_v62  ;;  %vm1098_vm11 = vcmp.ne.s32.totalorder %v392_v3, %v1076_v59  ;;  %vm1103_vm12 = vcmp.ne.s32.totalorder %v393_v4, %v1079_v62 }
  0x1b   : > { %vm391_vm10 = vmpackc.low %vm1087_vm9, %vm1082_vm8 }
  0x1c   : > { %vm398_vm13 = vmpackc.low %vm1103_vm12, %vm1098_vm11 }
  0x1d   : > { %469 = vrot.lane.b32.xlu0 %v407_v31, %s985_s29  ;;  %296 = vmatpush.bf16.msra.mxu0 %v902_v32  ;;  %v921_v32 = vld [vmem:[%s1332_s2 + $0x8] sm:$0xf0] }
  0x1e   : > { %310 = vmatpush.bf16.msra.mxu1 %v906_v33 }
  0x20   : > { %915 = vmatmul.msk.bf16.vlgmr.msra.gmra.mxu0 %vm278_vm7, %v937_v34  ;;  %501 = vrot.lane.b32.xlu1 %v384_v35, %s984_s28 }
  0x21   : > { %916 = vmatmul.msk.bf16.vlgmr.msra.gmra.mxu1 %vm278_vm7, %v937_v34  ;;  %441 = vrot.lane.b32.xlu2 %v384_v35, %s987_s8  ;;  %vm443_vm7 = vcmask 130048  }
  0x25   : > { %531 = vrot.lane.b32.xlu0 %v408_v36, %s986_s30 }
  0x28   : > { %471 = vrot.lane.b32.xlu1 %v408_v36, %s985_s29 }
  0x2d   : > { %409 = vrot.lane.b32.xlu0 %v407_v31, %s988_s9 }
  0x30   : > { %439 = vrot.lane.b32.xlu1 %v383_v29, %s987_s8 }
  0x38   : > { %411 = vrot.lane.b32.xlu1 %v408_v36, %s988_s9 }
  0x73   : > { %v1095_v5 = vpop.permute.xlu2 %529 }
  0x74   : > { %v535_v27 = vunpack.c.l.b16 %v1095_v5  ;;  %v536_v28 = vunpack.c.h.b16 %v1095_v5 }
  0x76   : > { %vm540_vm11 = vcmp.ne.s32.totalorder %v536_v28, %v1079_v62 }
  0x7b   : > { %v1111_v8 = vpop.permute.xlu2 %441 }
  0x7c   : > { %v460_v2 = vunpack.c.h.b16 %v1111_v8 }
  0x7f   : > { %v241_v37 = vpop.permute.xlu0 %240 }
  0x87   : > { %v246_v42 = vpop.permute.xlu0 %245 }
  0x8a   : > { %v500_v7 = vpop.permute.xlu1 %499 }
  0x8b   : > { %v505_v10 = vunpack.c.l.b16 %v500_v7  ;;  %v506_v11 = vunpack.c.h.b16 %v500_v7 }
  0x8d   : > { %vm509_vm15 = vcmp.ne.s32.totalorder %v505_v10, %v1076_v59  ;;  %vm510_vm0 = vcmp.ne.s32.totalorder %v506_v11, %v1079_v62 }
  0x8e   : > { %vm511_vm1 = vmpackc.low %vm510_vm0, %vm509_vm15  ;;  %vm533_vm15 = vcmask 277504  }
  0x8f   : > { %v470_v15 = vpop.permute.xlu0 %469 }
  0x90   : > { %v475_v16 = vunpack.c.l.b16 %v470_v15  ;;  %v476_v17 = vunpack.c.h.b16 %v470_v15 }
  0x92   : > { %v1113_v9 = vpop.permute.xlu1 %501  ;;  %vm479_vm3 = vcmp.ne.s32.totalorder %v475_v16, %v1076_v59  ;;  %vm480_vm4 = vcmp.ne.s32.totalorder %v476_v17, %v1079_v62 }
  0x93   : > { %v504_v24 = vsel %vm503_vm2, %v500_v7, %v1113_v9  ;;  %vm481_vm5 = vmpackc.low %vm480_vm4, %vm479_vm3  ;;  %v519_v36 = vunpack.c.l.b16 %v1113_v9 }
  0x94   : > { %v512_v25 = vunpack.c.l.b16 %v504_v24  ;;  %v513_v26 = vunpack.c.h.b16 %v504_v24 }
  0x95   : > { %vm1194_vm0 = vcmp.ne.s32.totalorder %v519_v36, %v1076_v59 }
  0x96   : > { %vm1163_vm8 = vcmp.ne.s32.totalorder %v512_v25, %v1076_v59  ;;  %vm1168_vm9 = vcmp.ne.s32.totalorder %v513_v26, %v1079_v62 }
  0x97   : > { %v1159_v31 = vpop.permute.xlu0 %531  ;;  %vm518_vm12 = vmpackc.low %vm1168_vm9, %vm1163_vm8 }
  0x98   : > { %v550_v10 = vunpack.c.h.b16 %v1159_v31 }
  0x9a   : > { %v1129_v18 = vpop.permute.xlu1 %471 }
  0x9b   : > { %v474_v34 = vsel %vm473_vm6, %v470_v15, %v1129_v18 }
  0x9d   : > { %v298_v38 = vpop.f32.mrf.mxu0 }
  0x9e   : > { %v312_v39 = vpop.f32.mrf.mxu1  ;;  %v299_v40 = vadd.f32 %v298_v38, %v241_v37  ;;  %v482_v38 = vunpack.c.l.b16 %v474_v34 }
  0x9f   : > { %v313_v41 = vadd.f32 %v312_v39, %v241_v37  ;;  %v520_v37 = vunpack.c.h.b16 %v1113_v9  ;;  %v483_v39 = vunpack.c.h.b16 %v474_v34 }
  0xa0   : > { %v317_v43 = vmax.f32 %v299_v40, 0.0  ;;  %vm1206_vm2 = vcmp.ne.s32.totalorder %v482_v38, %v1076_v59 }
  0xa1   : > { %v318_v44 = vmax.f32 %v313_v41, 0.0  ;;  %vm1211_vm3 = vcmp.ne.s32.totalorder %v483_v39, %v1079_v62 }
  0xa2   : > { %v1154_v29 = vpop.permute.xlu1 %439  ;;  %vm488_vm8 = vmpackc.low %vm1211_vm3, %vm1206_vm2 }
  0xa3   : > { %v321_v49 = vpack.c.bf16 %v318_v44, %v317_v43  ;;  %v444_v35 = vsel %vm443_vm7, %v1154_v29, %v1111_v8  ;;  %v445_v63 = vunpack.c.l.b16 %v1154_v29  ;;  %v446_v0 = vunpack.c.h.b16 %v1154_v29 }
  0xa4   : > { %v452_v40 = vunpack.c.l.b16 %v444_v35  ;;  %v453_v41 = vunpack.c.h.b16 %v444_v35 }
  0xa5   : > { %v300_v45 = vpop.f32.mrf.mxu0  ;;  %v325_v53 = vunpack.c.l.b16 %v321_v49  ;;  %v326_v57 = vunpack.c.h.b16 %v321_v49  ;;  %vm449_vm3 = vcmp.ne.s32.totalorder %v445_v63, %v1076_v59  ;;  %v919_v63 = vld [vmem:[%s1332_s2] sm:$0xf] }
  0xa6   : > { %v314_v46 = vpop.f32.mrf.mxu1  ;;  %v301_v47 = vadd.f32 %v300_v45, %v246_v42  ;;  %v1190_v45 = vpop.permute.xlu0 %409  ;;  %vm456_vm4 = vcmp.ne.s32.totalorder %v452_v40, %v1076_v59 }
  0xa7   : > { %v315_v48 = vadd.f32 %v314_v46, %v246_v42  ;;  %v415_v7 = vunpack.c.l.b16 %v1190_v45  ;;  %v416_v9 = vunpack.c.h.b16 %v1190_v45 }
  0xa8   : > { %v319_v50 = vmax.f32 %v301_v47, 0.0  ;;  %v228_v47 = vld [vmem:[%s1334_s4 + $0x10] sm:$0xff] }
  0xa9   : > { %v320_v51 = vmax.f32 %v315_v48, 0.0 }
  0xaa   : > { %v1184_v42 = vpop.permute.xlu1 %411 }
  0xab   : > { %v322_v52 = vpack.c.bf16 %v320_v51, %v319_v50  ;;  %v489_v51 = vunpack.c.l.b16 %v1129_v18  ;;  %v429_v11 = vunpack.c.l.b16 %v1184_v42 }
  0xad   : > { %v327_v54 = vunpack.c.l.b16 %v322_v52  ;;  %v328_v56 = vunpack.c.h.b16 %v322_v52  ;;  %v490_v52 = vunpack.c.h.b16 %v1129_v18 }
  0xaf   : > { %v329_v55 = vpack.c.b16 %v327_v54, %v325_v53  ;;  %v330_v58 = vpack.c.b16 %v328_v56, %v326_v57  ;;  %v534_v53 = vsel %vm533_vm15, %v1095_v5, %v1159_v31  ;;  %v459_v5 = vunpack.c.l.b16 %v1111_v8 }
  0xb0   : > { %v542_v56 = vunpack.c.l.b16 %v534_v53  ;;  %v543_v60 = vunpack.c.h.b16 %v534_v53  ;;  %v549_v8 = vunpack.c.l.b16 %v1159_v31  ;;  %v938_v31 = vld [vmem:[%s1332_s2 + $0x4] sm:$0xf] }
  0xb1   : > { %331 = vrot.lane.b32.xlu2 %v329_v55, %s989_s10  ;;  %v924_v38 = vor.u32 %v938_v31, %v921_v32 }
  0xb2   : > { %vm546_vm15 = vcmp.ne.s32.totalorder %v542_v56, %v1076_v59 }
  0xb9   : > { %333 = vrot.lane.b32.xlu2 %v330_v58, %s989_s10 }
 0x10b   : > { %v332_v12 = vpop.permute.xlu2 %331 }
 0x10c   : > { %v1116_v13 = vsel %vm335_vm14, 0, %v332_v12 }
 0x10d   : > { %639 = vrot.lane.b32.xlu1 %v1116_v13, %s990_s11  ;;  %v1127_v14 = vsel %vm391_vm10, %v1116_v13, 0  ;;  %v526_v22 = vsel %vm511_vm1, %v1116_v13, 0  ;;  %v496_v30 = vsel %vm481_vm5, %v1116_v13, 0  ;;  %vm539_vm10 = vcmp.ne.s32.totalorder %v535_v27, %v1076_v59 }
 0x10e   : > { %vm1199_vm1 = vcmp.ne.s32.totalorder %v520_v37, %v1079_v62  ;;  %vm457_vm5 = vcmp.ne.s32.totalorder %v453_v41, %v1079_v62 }
 0x10f   : > { %vm525_vm6 = vmpackc.low %vm1199_vm1, %vm1194_vm0  ;;  %vm547_vm0 = vcmp.ne.s32.totalorder %v543_v60, %v1079_v62 }
 0x110   : > { %vm458_vm9 = vmpackc.low %vm457_vm5, %vm456_vm4  ;;  %vm450_vm4 = vcmp.ne.s32.totalorder %v446_v0, %v1079_v62  ;;  %v939_v0 = vld [vmem:[%s1332_s2 + $0x4] sm:$0xf0] }
 0x111   : > { %vm548_vm2 = vmpackc.low %vm547_vm0, %vm546_vm15 }
 0x112   : > { %vm451_vm5 = vmpackc.low %vm450_vm4, %vm449_vm3  ;;  %vm645_vm3 = vcmask 777216   ;;  %vm634_vm4 = vcmask 785408  }
 0x113   : > { %v334_v19 = vpop.permute.xlu2 %333  ;;  %v466_v15 = vsel %vm451_vm5, %v1116_v13, 0  ;;  %vm620_vm5 = vcmask 900096  }
 0x114   : > { %v1132_v20 = vsel %vm335_vm14, %v332_v12, %v334_v19  ;;  %v1135_v21 = vsel %vm335_vm14, %v334_v19, 0  ;;  %vm413_vm14 = vcmask 15360   ;;  %v430_v12 = vunpack.c.h.b16 %v1184_v42 }
 0x115   : > { %628 = vrot.lane.b32.xlu1 %v526_v22, %s991_s12  ;;  %643 = vrot.lane.b32.xlu0 %v1135_v21, %s990_s11  ;;  %v1149_v23 = vsel %vm398_vm13, %v1132_v20, 0  ;;  %vm541_vm13 = vmpackc.low %vm540_vm11, %vm539_vm10  ;;  %v527_v44 = vsel %vm518_vm12, %v1132_v20, 0  ;;  %v414_v48 = vsel %vm413_vm14, %v1190_v45, %v1184_v42  ;;  %v528_v57 = vsel %vm525_vm6, %v1135_v21, 0 }
 0x116   : > { %641 = vrot.lane.b32.xlu2 %v1132_v20, %s990_s11  ;;  %v556_v43 = vsel %vm541_vm13, %v1116_v13, 0  ;;  %v422_v54 = vunpack.c.l.b16 %v414_v48  ;;  %v423_v55 = vunpack.c.h.b16 %v414_v48  ;;  %v467_v58 = vsel %vm458_vm9, %v1132_v20, 0 }
 0x117   : > { %v497_v61 = vsel %vm488_vm8, %v1132_v20, 0  ;;  %vm493_vm10 = vcmp.ne.s32.totalorder %v489_v51, %v1076_v59  ;;  %vm494_vm11 = vcmp.ne.s32.totalorder %v490_v52, %v1079_v62  ;;  %v557_v6 = vsel %vm548_vm2, %v1132_v20, 0 }
 0x118   : > { %vm426_vm12 = vcmp.ne.s32.totalorder %v422_v54, %v1076_v59  ;;  %vm427_vm13 = vcmp.ne.s32.totalorder %v423_v55, %v1079_v62  ;;  %vm495_vm14 = vmpackc.low %vm494_vm11, %vm493_vm10  ;;  %vm463_vm6 = vcmp.ne.s32.totalorder %v459_v5, %v1076_v59  ;;  %vm464_vm8 = vcmp.ne.s32.totalorder %v460_v2, %v1079_v62 }
 0x119   : > { %vm428_vm1 = vmpackc.low %vm427_vm13, %vm426_vm12  ;;  %v498_v3 = vsel %vm495_vm14, %v1135_v21, 0  ;;  %vm419_vm10 = vcmp.ne.s32.totalorder %v415_v7, %v1076_v59  ;;  %vm420_vm11 = vcmp.ne.s32.totalorder %v416_v9, %v1079_v62  ;;  %vm553_vm12 = vcmp.ne.s32.totalorder %v549_v8, %v1076_v59  ;;  %v230_v7 = vld [vmem:[%s1334_s4 + $0x20] sm:$0x1] }
 0x11a   : > { %v437_v4 = vsel %vm428_vm1, %v1132_v20, 0  ;;  %vm465_vm9 = vmpackc.low %vm464_vm8, %vm463_vm6  ;;  %vm554_vm13 = vcmp.ne.s32.totalorder %v550_v10, %v1079_v62  ;;  %vm433_vm14 = vcmp.ne.s32.totalorder %v429_v11, %v1076_v59  ;;  %vm434_vm15 = vcmp.ne.s32.totalorder %v430_v12, %v1079_v62  ;;  %v229_v59 = vld [vmem:[%s1334_s4 + $0x18] sm:$0xff] }
 0x11b   : > { %v468_v16 = vsel %vm465_vm9, %v1135_v21, 0  ;;  %vm421_vm0 = vmpackc.low %vm420_vm11, %vm419_vm10  ;;  %vm659_vm6 = vcmask 769024   ;;  %vm606_vm8 = vcmask 908288   ;;  %vm595_vm9 = vcmask 916480  }
 0x11c   : > { %vm555_vm1 = vmpackc.low %vm554_vm13, %vm553_vm12  ;;  %v436_v17 = vsel %vm421_vm0, %v1116_v13, 0  ;;  %vm581_vm10 = vcmask 1031168   ;;  %vm567_vm11 = vcmask 1039360  }
 0x11d   : > { %614 = vrot.lane.b32.xlu1 %v496_v30, %s992_s13  ;;  %604 = vrot.lane.b32.xlu0 %v1135_v21, %s993_s14  ;;  %vm435_vm2 = vmpackc.low %vm434_vm15, %vm433_vm14  ;;  %v558_v18 = vsel %vm555_vm1, %v1135_v21, 0 }
 0x11e   : > { %602 = vrot.lane.b32.xlu2 %v1132_v20, %s993_s14  ;;  %v438_v19 = vsel %vm435_vm2, %v1135_v21, 0  ;;  %vm827_vm2 = vcmask 1040384  }
 0x125   : > { %653 = vrot.lane.b32.xlu1 %v556_v43, %s994_s15  ;;  %600 = vrot.lane.b32.xlu0 %v1116_v13, %s993_s14 }
 0x126   : > { %630 = vrot.lane.b32.xlu2 %v527_v44, %s991_s12 }
 0x12d   : > { %632 = vrot.lane.b32.xlu0 %v528_v57, %s991_s12  ;;  %591 = vrot.lane.b32.xlu1 %v467_v58, %s995_s16  ;;  %s894_s12 = sshll.u32 %s1363_s19, 1 }
 0x12e   : > { %616 = vrot.lane.b32.xlu2 %v497_v61, %s992_s13 }
 0x135   : > { %618 = vrot.lane.b32.xlu0 %v498_v3, %s992_s13  ;;  %577 = vrot.lane.b32.xlu1 %v437_v4, %s996_s17  ;;  %v920_v3 = vor.u32 %v939_v0, %v919_v63 }
 0x136   : > { %655 = vrot.lane.b32.xlu2 %v557_v6, %s994_s15 }
 0x13d   : > { %589 = vrot.lane.b32.xlu0 %v466_v15, %s995_s16  ;;  %563 = vrot.lane.b32.xlu1 %v1132_v20, %s997_s20 }
 0x13e   : > { %593 = vrot.lane.b32.xlu2 %v468_v16, %s995_s16 }
 0x145   : > { %575 = vrot.lane.b32.xlu0 %v436_v17, %s996_s17  ;;  %657 = vrot.lane.b32.xlu1 %v558_v18, %s994_s15  ;;  %s222_s15 = scalar_lea.vmem %s1335_s5, %s894_s12 }
 0x146   : > { %579 = vrot.lane.b32.xlu2 %v438_v19, %s996_s17 }
 0x14d   : > { %561 = vrot.lane.b32.xlu0 %v1116_v13, %s997_s20  ;;  %754 = vperm.xlu1 %966, %v230_v7  }
 0x14e   : > { %565 = vrot.lane.b32.xlu2 %v1135_v21, %s997_s20 }
 0x155   : > { %673 = vperm.xlu0 %964, %v229_v59  }
 0x156   : > { %668 = vperm.xlu2 %965, %v228_v47  }
 0x170   : > { %v642_v62 = vpop.permute.xlu2 %641 }
 0x178   : > { %v603_v20 = vpop.permute.xlu2 %602 }
 0x17f   : > { %v640_v22 = vpop.permute.xlu1 %639 }
 0x180   : > { %v646_v24 = vsel %vm645_vm3, %v640_v22, %v642_v62  ;;  %v631_v25 = vpop.permute.xlu2 %630 }
 0x181   : > { %689 = vmatpush.bf16.msra.mxu2 %v646_v24 }
 0x187   : > { %v629_v26 = vpop.permute.xlu1 %628  ;;  %v644_v27 = vpop.permute.xlu0 %643 }
 0x188   : > { %v635_v13 = vsel %vm634_vm4, %v629_v26, %v631_v25  ;;  %v617_v21 = vpop.permute.xlu2 %616  ;;  %v647_v39 = vsel %vm645_vm3, %v642_v62, %v644_v27  ;;  %v749_v26 = vld [vmem:[%s1333_s3] sm:$0x1]  ;;  %vm832_vm3 = vcmp.lt.s32.totalorder %v346_v1, 256 }
 0x189   : > { %690 = vmatpush.bf16.msra.mxu2 %v635_v13 }
 0x18f   : > { %v615_v28 = vpop.permute.xlu1 %614  ;;  %v605_v29 = vpop.permute.xlu0 %604 }
 0x190   : > { %v621_v30 = vsel %vm620_vm5, %v615_v28, %v617_v21  ;;  %v656_v33 = vpop.permute.xlu2 %655  ;;  %v608_v49 = vsel %vm606_vm8, %v603_v20, %v605_v29 }
 0x191   : > { %691 = vmatpush.bf16.msra.mxu2 %v621_v30 }
 0x197   : > { %v654_v34 = vpop.permute.xlu1 %653  ;;  %v601_v35 = vpop.permute.xlu0 %600 }
 0x198   : > { %v607_v36 = vsel %vm606_vm8, %v601_v35, %v603_v20  ;;  %v660_v37 = vsel %vm659_vm6, %v654_v34, %v656_v33  ;;  %v594_v43 = vpop.permute.xlu2 %593 }
 0x199   : > { %692 = vmatpush.bf16.msra.mxu2 %v607_v36  ;;  %710 = vmatpush.bf16.msra.mxu3 %v660_v37 }
 0x19c   : > { %925 = vmatmul.msk.bf16.vlgmr.msra.gmra.mxu3 %vm443_vm7, %v924_v38 }
 0x19d   : > { %717 = vmatpush.bf16.msrb.mxu3 %v647_v39 }
 0x19f   : > { %v633_v40 = vpop.permute.xlu0 %632  ;;  %v592_v41 = vpop.permute.xlu1 %591 }
 0x1a0   : > { %v636_v42 = vsel %vm634_vm4, %v631_v25, %v633_v40  ;;  %v580_v48 = vpop.permute.xlu2 %579  ;;  %v597_v53 = vsel %vm595_vm9, %v592_v41, %v594_v43 }
 0x1a1   : > { %718 = vmatpush.bf16.msrb.mxu3 %v636_v42 }
 0x1a7   : > { %v619_v44 = vpop.permute.xlu0 %618  ;;  %v578_v45 = vpop.permute.xlu1 %577 }
 0x1a8   : > { %v622_v46 = vsel %vm620_vm5, %v617_v21, %v619_v44  ;;  %v583_v54 = vsel %vm581_vm10, %v578_v45, %v580_v48  ;;  %v566_v55 = vpop.permute.xlu2 %565 }
 0x1a9   : > { %719 = vmatpush.bf16.msrb.mxu3 %v622_v46 }
 0x1ad   : > { %720 = vmatpush.bf16.msrb.mxu3 %v608_v49 }
 0x1af   : > { %v590_v50 = vpop.permute.xlu0 %589  ;;  %v564_v51 = vpop.permute.xlu1 %563 }
 0x1b0   : > { %v596_v52 = vsel %vm595_vm9, %v590_v50, %v592_v41  ;;  %v569_v60 = vsel %vm567_vm11, %v564_v51, %v566_v55 }
 0x1b1   : > { %693 = vmatpush.bf16.msra.mxu2 %v596_v52  ;;  %721 = vmatpush.bf16.msrb.mxu3 %v597_v53 }
 0x1b5   : > { %722 = vmatpush.bf16.msrb.mxu3 %v583_v54 }
 0x1b7   : > { %v576_v56 = vpop.permute.xlu0 %575  ;;  %v658_v57 = vpop.permute.xlu1 %657 }
 0x1b8   : > { %v582_v58 = vsel %vm581_vm10, %v576_v56, %v578_v45  ;;  %v661_v61 = vsel %vm659_vm6, %v656_v33, %v658_v57 }
 0x1b9   : > { %694 = vmatpush.bf16.msra.mxu2 %v582_v58  ;;  %723 = vmatpush.bf16.msrb.mxu3 %v569_v60 }
 0x1ba   : > { %738 = vmatpush.bf16.msrb.mxu0 %v661_v61 }
 0x1bd   : > { %724 = vmatpush.bf16.msrb.mxu3 %v1149_v23  ;;  %926 = vmatmul.msk.bf16.vlgmr.msrb.gmra.mxu0 %vm443_vm7, %v924_v38  ;;  %v669_v23 = vpop.permute.xlu2 %668 }
 0x1bf   : > { %v562_v4 = vpop.permute.xlu0 %561  ;;  %v755_v29 = vpop.permute.xlu1 %754 }
 0x1c0   : > { %725 = vmatmul.bf16.vlgmr.msrb.gmra.mxu3 %v920_v3  ;;  %v568_v5 = vsel %vm567_vm11, %v562_v4, %v564_v51 }
 0x1c1   : > { %695 = vmatpush.bf16.msra.mxu2 %v568_v5 }
 0x1c5   : > { %696 = vmatpush.bf16.msra.mxu2 %v1127_v14 }
 0x1c7   : > { %v674_v11 = vpop.permute.xlu0 %673 }
 0x1c8   : > { %697 = vmatmul.bf16.vlgmr.msra.gmra.mxu2 %v920_v3 }
 0x21f   : > { %v712_v2 = vpop.f32.mrf.mxu3 }
 0x227   : > { %v714_v6 = vpop.f32.mrf.mxu3 }
 0x23a   : > { %v740_v8 = vpop.f32.mrf.mxu0 }
 0x242   : > { %v742_v18 = vpop.f32.mrf.mxu0 }
 0x243   : > { %v726_v9 = vpop.f32.mrf.mxu3 }
 0x244   : > { %v727_v10 = vadd.f32 %v726_v9, %v669_v23 }
 0x246   : > { %v741_v16 = vadd.f32 %v740_v8, %v727_v10 }
 0x248   : > { %v746_v14 = vmax.f32 %v741_v16, 0.0 }
 0x24b   : > { %v698_v12 = vpop.f32.mrf.mxu2  ;;  %v728_v15 = vpop.f32.mrf.mxu3 }
 0x24c   : > { %v729_v17 = vadd.f32 %v728_v15, %v674_v11  ;;  %v699_v59 = vadd.f32 %v698_v12, %v669_v23 }
 0x24e   : > { %v743_v19 = vadd.f32 %v742_v18, %v729_v17  ;;  %v713_v24 = vadd.f32 %v712_v2, %v699_v59 }
 0x250   : > { %v748_v62 = vmax.f32 %v743_v19, 0.0  ;;  %v745_v13 = vmax.f32 %v713_v24, 0.0 }
 0x252   : > { %v751_v20 = vpack.c.bf16 %v748_v62, %v746_v14 }
 0x253   : > { %v700_v22 = vpop.f32.mrf.mxu2 }
 0x254   : > { %v701_v25 = vadd.f32 %v700_v22, %v674_v11  ;;  %780 = vmatpush.bf16.msra.mxu0 %v751_v20 }
 0x256   : > { %v715_v27 = vadd.f32 %v714_v6, %v701_v25 }
 0x257   : > { %928 = vmatmul.msk.bf16.vlgmr.msra.gmra.mxu0 %vm443_vm7, %v749_v26 }
 0x258   : > { %v747_v21 = vmax.f32 %v715_v27, 0.0 }
 0x25a   : > { %v750_v28 = vpack.c.bf16 %v747_v21, %v745_v13 }
 0x25c   : > { %767 = vmatpush.bf16.msrb.mxu1 %v750_v28 }
 0x25f   : > { %927 = vmatmul.msk.bf16.vlgmr.msrb.gmra.mxu1 %vm443_vm7, %v749_v26 }
 0x2d4   : > { %v782_v30 = vpop.f32.mrf.mxu0 }
 0x2d5   : > { %v783_v31 = vadd.f32 %v782_v30, %v755_v29 }
 0x2d7   : > { %v930_v32 = vmul.f32 -1.442695, %v783_v31 }
 0x2d9   : > { %967 = vpow2.f32 %v930_v32 }
 0x2dc   : > { %v769_v33 = vpop.f32.mrf.mxu1  ;;  %v784_v34 = vpop.f32.mrf.mxu0 }
 0x2dd   : > { %v770_v35 = vadd.f32 %v769_v33, %v755_v29 }
 0x2df   : > { %v968_v36 = vpop.eup %967  ;;  %v929_v37 = vmul.f32 -1.442695, %v770_v35 }
 0x2e0   : > { %v793_v38 = vadd.f32 1.0, %v968_v36 }
 0x2e1   : > { %969 = vpow2.f32 %v929_v37 }
 0x2e2   : > { %971 = vrcp.f32 %v793_v38  ;;  %vm814_vm7 = vweird.f32 %v793_v38  ;;  %v820_v48 = vand.u32 2147483648, %v793_v38  ;;  %v818_v49 = vand.u32 2147483647, %v793_v38 }
 0x2e4   : > { %v771_v39 = vpop.f32.mrf.mxu1  ;;  %v821_v53 = vor.u32 1.1754944e-38, %v820_v48  ;;  %vm819_vm14 = vcmp.eq.f32.partialorder %v818_v49, 8.507059e+37 }
 0x2e7   : > { %v970_v40 = vpop.eup %969 }
 0x2e8   : > { %v972_v41 = vpop.eup %971  ;;  %v792_v42 = vadd.f32 1.0, %v970_v40 }
 0x2e9   : > { %v810_v43 = vmul.f32 %v972_v41, %v793_v38  ;;  %vm815_vm12 = vweird.f32 %v972_v41 }
 0x2ea   : > { %973 = vrcp.f32 %v792_v42  ;;  %vm816_vm13 = vmor %vm814_vm7, %vm815_vm12  ;;  %v805_v54 = vand.u32 2147483648, %v792_v42  ;;  %v803_v56 = vand.u32 2147483647, %v792_v42  ;;  %vm799_vm0 = vweird.f32 %v792_v42 }
 0x2eb   : > { %v811_v44 = vsub.f32 1.0, %v810_v43 }
 0x2ec   : > { %v806_v60 = vor.u32 1.1754944e-38, %v805_v54  ;;  %vm804_vm4 = vcmp.eq.f32.partialorder %v803_v56, 8.507059e+37 }
 0x2ed   : > { %v812_v45 = vmul.f32 %v972_v41, %v811_v44 }
 0x2ef   : > { %v813_v46 = vadd.f32 %v972_v41, %v812_v45 }
 0x2f0   : > { %v974_v47 = vpop.eup %973 }
 0x2f1   : > { %v795_v50 = vmul.f32 %v974_v47, %v792_v42  ;;  %v817_v51 = vsel %vm816_vm13, %v972_v41, %v813_v46  ;;  %vm800_vm15 = vweird.f32 %v974_v47 }
 0x2f2   : > { %v822_v57 = vsel %vm819_vm14, %v821_v53, %v817_v51  ;;  %vm801_vm1 = vmor %vm799_vm0, %vm800_vm15 }
 0x2f3   : > { %v796_v52 = vsub.f32 1.0, %v795_v50  ;;  %v826_v61 = vrot.slane %v822_v57, 7 }
 0x2f5   : > { %v797_v55 = vmul.f32 %v974_v47, %v796_v52 }
 0x2f7   : > { %v798_v58 = vadd.f32 %v974_v47, %v797_v55 }
 0x2f9   : > { %v802_v63 = vsel %vm801_vm1, %v974_v47, %v798_v58 }
 0x2fa   : > { %v807_v0 = vsel %vm804_vm4, %v806_v60, %v802_v63 }
 0x2fb   : > { %v828_v3 = vsel %vm827_vm2, %v807_v0, %v826_v61 }
 0x2fc   : > { %834 = vst.msk [vmem:[%s222_s15] sm:$0x3] %vm832_vm3, %v828_v3 }
 0x2fd PF: > { %s15_s18 = sadd.s32 1, %s981_s18  }
 0x2fe   : > { %p12_p4 = scmp.ge.s32.totalorder %s15_s18, 4  }
 0x300   :  { %14 = sbr.rel (!%p12_p4) target bundleno = 1 (0x1), region = 70 }

</bundles_post_ra>
